<compile_context>
chip_gen: v7x
topology: tpu7x:2x2x1
jax: 0.10.0
libtpu: 0.0.40
codegen_flags: <defaults>
</compile_context>

<pallas_src>
import functools
import math

import jax
import jax.numpy as jnp
from jax.experimental import pallas as pl
from jax.experimental.pallas import tpu as pltpu


_TARGET_BLOCK_ELEMS = 512 * 1024  # ~2 MiB of f32 per input block


def _mish_f32(x):
    """mish(x) = x * tanh(softplus(x)), computed stably from a single exp.

    With e = exp(-|x|):
      x >= 0: tanh(softplus(x)) = (1 + 2e) / (1 + 2e + 2e^2)
      x <  0: tanh(softplus(x)) = (e^2 + 2e) / (e^2 + 2e + 2)
    Matches torch.nn.functional.softplus (threshold=20) followed by tanh to
    f32 precision, with 2 EUP ops (exp, reciprocal) instead of 3.
    """
    e = jnp.exp(-jnp.abs(x))
    e2 = e * e
    pos = x >= 0.0
    num = 2.0 * e + jnp.where(pos, 1.0, e2)
    den = num + jnp.where(pos, 2.0 * e2, 2.0)
    return x * num * pl.reciprocal(den, approx=False)


def _bn_mish_kernel(y_ref, s_ref, b_ref, o_ref):
    y = y_ref[...].astype(jnp.float32)               # (bc, bhw)
    z = y * s_ref[...] + b_ref[...]                  # folded-BN per-channel affine
    o_ref[...] = _mish_f32(z).astype(o_ref.dtype)


def _bn_mish_add_kernel(y_ref, s_ref, b_ref, r_ref, o_ref):
    y = y_ref[...].astype(jnp.float32)
    z = y * s_ref[...] + b_ref[...]
    out = _mish_f32(z) + r_ref[...].astype(jnp.float32)   # fused residual add
    o_ref[...] = out.astype(o_ref.dtype)


def _pick_tile(dim: int, unit: int, cap: int) -> int:
    """Largest multiple of `unit` that divides `dim` and is <= cap.
    Falls back to the full dim when `dim` is not a multiple of `unit`
    (allowed by the TPU tiling rule: block dim == full array dim)."""
    if dim % unit != 0:
        return dim
    cap = max(unit, min(cap, dim))
    best = unit
    for d in range(unit, cap + 1, unit):
        if dim % d == 0:
            best = d
    return best


def fused_bn_mish(y, scale, shift, residual=None):
    """out = mish(y * scale[c] + shift[c]) (+ residual), in one Pallas kernel.

    y:        (N, C, H, W) conv output
    scale:    (C,) folded BatchNorm scale = gamma / sqrt(var + eps)
    shift:    (C,) folded BatchNorm shift = beta - mean * scale
    residual: optional (N, C, H, W) tensor added after the activation
    """
    N, C, H, W = y.shape
    HW = H * W

    y3 = y.reshape(N, C, HW)                       # free view, no copy
    s2 = scale.astype(jnp.float32).reshape(C, 1)
    b2 = shift.astype(jnp.float32).reshape(C, 1)

    bhw = _pick_tile(HW, 128, _TARGET_BLOCK_ELEMS)
    bc = _pick_tile(C, 8, max(8, _TARGET_BLOCK_ELEMS // bhw))
    grid = (N, C // bc, HW // bhw)                 # divides exactly: no masking

    data_spec = pl.BlockSpec((None, bc, bhw), lambda n, c, s: (n, c, s))
    chan_spec = pl.BlockSpec((bc, 1), lambda n, c, s: (c, 0))

    if residual is None:
        kernel = _bn_mish_kernel
        operands = (y3, s2, b2)
        in_specs = [data_spec, chan_spec, chan_spec]
    else:
        kernel = _bn_mish_add_kernel
        operands = (y3, s2, b2, residual.reshape(N, C, HW))
        in_specs = [data_spec, chan_spec, chan_spec, data_spec]

    out3 = pl.pallas_call(
        kernel,
        out_shape=jax.ShapeDtypeStruct((N, C, HW), y.dtype),
        grid=grid,
        in_specs=in_specs,
        out_specs=data_spec,
        compiler_params=pltpu.CompilerParams(
            dimension_semantics=("parallel", "parallel", "parallel")),
    )(*operands)
    return out3.reshape(N, C, H, W)


def _conv2d(x, w, pad):
    # TODO(synk): the convolution itself is left to XLA; a Pallas conv/matmul
    # kernel is out of scope for this elementwise-fusion pass.
    return jax.lax.conv_general_dilated(
        x, w, window_strides=(1, 1),
        padding=((pad, pad), (pad, pad)),
        dimension_numbers=("NCHW", "OIHW", "NCHW"))


def resblock_forward(x, params, shortcut=True):
    """ResBlock forward: Pallas-fused BN+Mish(+residual) after each XLA conv."""
    for (w1, s1, b1, w2, s2, b2) in params:
        h = _conv2d(x, w1, 0)                        # 1x1 conv
        h = fused_bn_mish(h, s1, b1)                 # BN + Mish (fused)
        h = _conv2d(h, w2, 1)                        # 3x3 conv
        if shortcut:
            x = fused_bn_mish(h, s2, b2, residual=x) # BN + Mish + skip add (fused)
        else:
            x = fused_bn_mish(h, s2, b2)
    return x


# ----------------------- pure-JAX reference (no Pallas) -----------------------

def _mish_ref(x):
    sp = jnp.maximum(x, 0.0) + jnp.log1p(jnp.exp(-jnp.abs(x)))
    return x * jnp.tanh(sp)


def resblock_ref(x, params, shortcut=True):
    for (w1, s1, b1, w2, s2, b2) in params:
        h = _conv2d(x, w1, 0)
        h = _mish_ref(h * s1[None, :, None, None] + b1[None, :, None, None])
        h = _conv2d(h, w2, 1)
        h = _mish_ref(h * s2[None, :, None, None] + b2[None, :, None, None])
        x = x + h if shortcut else h
    return x


# --------------------------------- params ------------------------------------

def init_resblock_params(key, ch, nblocks):
    # TODO(synk): BatchNorm is folded as inference-mode (running-stats) per-channel
    # scale/shift; training-mode batch statistics are not computed here.
    def folded_bn(k):
        kg, kb, km, kv = jax.random.split(k, 4)
        gamma = 1.0 + 0.1 * jax.random.normal(kg, (ch,), jnp.float32)
        beta = 0.1 * jax.random.normal(kb, (ch,), jnp.float32)
        mean = 0.1 * jax.random.normal(km, (ch,), jnp.float32)
        var = jnp.abs(1.0 + 0.1 * jax.random.normal(kv, (ch,), jnp.float32))
        scale = gamma * jax.lax.rsqrt(var + 1e-5)
        shift = beta - mean * scale
        return scale, shift

    params = []
    for _ in range(nblocks):
        key, k1, k2, k3, k4 = jax.random.split(key, 5)
        w1 = jax.random.normal(k1, (ch, ch, 1, 1), jnp.float32) / math.sqrt(ch)
        w2 = jax.random.normal(k2, (ch, ch, 3, 3), jnp.float32) / math.sqrt(9 * ch)
        s1, b1 = folded_bn(k3)
        s2, b2 = folded_bn(k4)
        params.append((w1, s1, b1, w2, s2, b2))
    return params


if __name__ == "__main__":
    key = jax.random.PRNGKey(0)
    k_x, k_p = jax.random.split(key)

    N, ch, H, W = 2, 4, 16, 16
    nblocks = 2
    x = jax.random.normal(k_x, (N, ch, H, W), dtype=jnp.float32)
    params = init_resblock_params(k_p, ch, nblocks)

    fwd = jax.jit(functools.partial(resblock_forward, shortcut=True))
    y = jax.block_until_ready(fwd(x, params))

    y_ref = resblock_ref(x, params, shortcut=True)

    assert y.shape == x.shape and y.dtype == x.dtype
    max_err = float(jnp.max(jnp.abs(y - y_ref)))
    assert jnp.allclose(y, y_ref, atol=1e-4, rtol=1e-4), max_err

    print("KERNEL_OK")
</pallas_src>

<mosaic_0001>
module attributes {stable_mosaic.version = 11 : i64} {
  func.func @_bn_mish_kernel(%arg0: i32, %arg1: i32, %arg2: i32, %arg3: memref<1x4x256xf32, #tpu.memory_space<vmem>>, %arg4: memref<4x1xf32, #tpu.memory_space<vmem>>, %arg5: memref<4x1xf32, #tpu.memory_space<vmem>>, %arg6: memref<1x4x256xf32, #tpu.memory_space<vmem>>) attributes {dimension_semantics = [#tpu.dimension_semantics<parallel>, #tpu.dimension_semantics<parallel>, #tpu.dimension_semantics<parallel>], iteration_bounds = array<i64: 2, 1, 1>, scalar_prefetch = 0 : i64, scratch_operands = 0 : i64, tpu.core_type = #tpu.core_type<tc>, window_params = [{transform_indices = @transform_0, window_bounds = array<i64: 1, 4, 256>}, {transform_indices = @transform_1, window_bounds = array<i64: 4, 1>}, {transform_indices = @transform_2, window_bounds = array<i64: 4, 1>}, {transform_indices = @transform_3, window_bounds = array<i64: 1, 4, 256>}]} {
    %c0 = arith.constant 0 : index
    %c0_0 = arith.constant 0 : index
    %c0_1 = arith.constant 0 : index
    %0 = vector.load %arg3[%c0, %c0_0, %c0_1] : memref<1x4x256xf32, #tpu.memory_space<vmem>>, vector<1x4x256xf32>
    %1 = vector.shape_cast %0 : vector<1x4x256xf32> to vector<4x256xf32>
    %c0_2 = arith.constant 0 : index
    %c0_3 = arith.constant 0 : index
    %2 = vector.load %arg4[%c0_2, %c0_3] : memref<4x1xf32, #tpu.memory_space<vmem>>, vector<4x1xf32>
    %3 = vector.broadcast %2 : vector<4x1xf32> to vector<4x256xf32>
    %4 = arith.mulf %1, %3 : vector<4x256xf32>
    %c0_4 = arith.constant 0 : index
    %c0_5 = arith.constant 0 : index
    %5 = vector.load %arg5[%c0_4, %c0_5] : memref<4x1xf32, #tpu.memory_space<vmem>>, vector<4x1xf32>
    %6 = vector.broadcast %5 : vector<4x1xf32> to vector<4x256xf32>
    %7 = arith.addf %4, %6 : vector<4x256xf32>
    %8 = math.absf %7 : vector<4x256xf32>
    %cst = arith.constant 0.000000e+00 : f32
    %9 = vector.broadcast %cst : f32 to vector<4x256xf32>
    %10 = arith.subf %9, %8 : vector<4x256xf32>
    %11 = math.exp %10 : vector<4x256xf32>
    %12 = arith.mulf %11, %11 : vector<4x256xf32>
    %cst_6 = arith.constant 0.000000e+00 : f32
    %13 = vector.broadcast %cst_6 : f32 to vector<4x256xf32>
    %14 = arith.cmpf oge, %7, %13 : vector<4x256xf32>
    %cst_7 = arith.constant 2.000000e+00 : f32
    %15 = vector.broadcast %cst_7 : f32 to vector<4x256xf32>
    %16 = arith.mulf %15, %11 : vector<4x256xf32>
    %cst_8 = arith.constant 1.000000e+00 : f32
    %17 = vector.broadcast %cst_8 : f32 to vector<4x256xf32>
    %18 = arith.select %14, %17, %12 : vector<4x256xi1>, vector<4x256xf32>
    %19 = arith.addf %16, %18 : vector<4x256xf32>
    %cst_9 = arith.constant 2.000000e+00 : f32
    %20 = vector.broadcast %cst_9 : f32 to vector<4x256xf32>
    %21 = arith.mulf %20, %12 : vector<4x256xf32>
    %cst_10 = arith.constant 2.000000e+00 : f32
    %22 = vector.broadcast %cst_10 : f32 to vector<4x256xf32>
    %23 = arith.select %14, %21, %22 : vector<4x256xi1>, vector<4x256xf32>
    %24 = arith.addf %19, %23 : vector<4x256xf32>
    %25 = arith.mulf %7, %19 : vector<4x256xf32>
    %26 = tpu.reciprocal %24 : vector<4x256xf32> -> vector<4x256xf32>
    %27 = arith.mulf %25, %26 : vector<4x256xf32>
    %c0_11 = arith.constant 0 : index
    %c0_12 = arith.constant 0 : index
    %c0_13 = arith.constant 0 : index
    %28 = vector.load %arg6[%c0_11, %c0_12, %c0_13] : memref<1x4x256xf32, #tpu.memory_space<vmem>>, vector<1x4x256xf32>
    %29 = vector.shape_cast %28 : vector<1x4x256xf32> to vector<4x256xf32>
    %30 = vector.shape_cast %27 : vector<4x256xf32> to vector<1x4x256xf32>
    tpu.vector_store %arg6[%c0_11, %c0_12, %c0_13], %30 {strides = array<i32>} : memref<1x4x256xf32, #tpu.memory_space<vmem>>, vector<1x4x256xf32>,
    return
  }
  func.func @transform_0(%arg0: i32, %arg1: i32, %arg2: i32) -> (i32, i32, i32) {
    %c0_i32 = arith.constant 0 : i32
    return %arg0, %arg1, %arg2 : i32, i32, i32
  }
  func.func @transform_1(%arg0: i32, %arg1: i32, %arg2: i32) -> (i32, i32) {
    %c0_i32 = arith.constant 0 : i32
    %c0_i32_0 = arith.constant 0 : i32
    return %arg1, %c0_i32 : i32, i32
  }
  func.func @transform_2(%arg0: i32, %arg1: i32, %arg2: i32) -> (i32, i32) {
    %c0_i32 = arith.constant 0 : i32
    %c0_i32_0 = arith.constant 0 : i32
    return %arg1, %c0_i32 : i32, i32
  }
  func.func @transform_3(%arg0: i32, %arg1: i32, %arg2: i32) -> (i32, i32, i32) {
    %c0_i32 = arith.constant 0 : i32
    return %arg0, %arg1, %arg2 : i32, i32, i32
  }
}

module attributes {stable_mosaic.version = 11 : i64} {
  func.func @_bn_mish_add_kernel(%arg0: i32, %arg1: i32, %arg2: i32, %arg3: memref<1x4x256xf32, #tpu.memory_space<vmem>>, %arg4: memref<4x1xf32, #tpu.memory_space<vmem>>, %arg5: memref<4x1xf32, #tpu.memory_space<vmem>>, %arg6: memref<1x4x256xf32, #tpu.memory_space<vmem>>, %arg7: memref<1x4x256xf32, #tpu.memory_space<vmem>>) attributes {dimension_semantics = [#tpu.dimension_semantics<parallel>, #tpu.dimension_semantics<parallel>, #tpu.dimension_semantics<parallel>], iteration_bounds = array<i64: 2, 1, 1>, scalar_prefetch = 0 : i64, scratch_operands = 0 : i64, tpu.core_type = #tpu.core_type<tc>, window_params = [{transform_indices = @transform_0, window_bounds = array<i64: 1, 4, 256>}, {transform_indices = @transform_1, window_bounds = array<i64: 4, 1>}, {transform_indices = @transform_2, window_bounds = array<i64: 4, 1>}, {transform_indices = @transform_3, window_bounds = array<i64: 1, 4, 256>}, {transform_indices = @transform_4, window_bounds = array<i64: 1, 4, 256>}]} {
    %c0 = arith.constant 0 : index
    %c0_0 = arith.constant 0 : index
    %c0_1 = arith.constant 0 : index
    %0 = vector.load %arg3[%c0, %c0_0, %c0_1] : memref<1x4x256xf32, #tpu.memory_space<vmem>>, vector<1x4x256xf32>
    %1 = vector.shape_cast %0 : vector<1x4x256xf32> to vector<4x256xf32>
    %c0_2 = arith.constant 0 : index
    %c0_3 = arith.constant 0 : index
    %2 = vector.load %arg4[%c0_2, %c0_3] : memref<4x1xf32, #tpu.memory_space<vmem>>, vector<4x1xf32>
    %3 = vector.broadcast %2 : vector<4x1xf32> to vector<4x256xf32>
    %4 = arith.mulf %1, %3 : vector<4x256xf32>
    %c0_4 = arith.constant 0 : index
    %c0_5 = arith.constant 0 : index
    %5 = vector.load %arg5[%c0_4, %c0_5] : memref<4x1xf32, #tpu.memory_space<vmem>>, vector<4x1xf32>
    %6 = vector.broadcast %5 : vector<4x1xf32> to vector<4x256xf32>
    %7 = arith.addf %4, %6 : vector<4x256xf32>
    %8 = math.absf %7 : vector<4x256xf32>
    %cst = arith.constant 0.000000e+00 : f32
    %9 = vector.broadcast %cst : f32 to vector<4x256xf32>
    %10 = arith.subf %9, %8 : vector<4x256xf32>
    %11 = math.exp %10 : vector<4x256xf32>
    %12 = arith.mulf %11, %11 : vector<4x256xf32>
    %cst_6 = arith.constant 0.000000e+00 : f32
    %13 = vector.broadcast %cst_6 : f32 to vector<4x256xf32>
    %14 = arith.cmpf oge, %7, %13 : vector<4x256xf32>
    %cst_7 = arith.constant 2.000000e+00 : f32
    %15 = vector.broadcast %cst_7 : f32 to vector<4x256xf32>
    %16 = arith.mulf %15, %11 : vector<4x256xf32>
    %cst_8 = arith.constant 1.000000e+00 : f32
    %17 = vector.broadcast %cst_8 : f32 to vector<4x256xf32>
    %18 = arith.select %14, %17, %12 : vector<4x256xi1>, vector<4x256xf32>
    %19 = arith.addf %16, %18 : vector<4x256xf32>
    %cst_9 = arith.constant 2.000000e+00 : f32
    %20 = vector.broadcast %cst_9 : f32 to vector<4x256xf32>
    %21 = arith.mulf %20, %12 : vector<4x256xf32>
    %cst_10 = arith.constant 2.000000e+00 : f32
    %22 = vector.broadcast %cst_10 : f32 to vector<4x256xf32>
    %23 = arith.select %14, %21, %22 : vector<4x256xi1>, vector<4x256xf32>
    %24 = arith.addf %19, %23 : vector<4x256xf32>
    %25 = arith.mulf %7, %19 : vector<4x256xf32>
    %26 = tpu.reciprocal %24 : vector<4x256xf32> -> vector<4x256xf32>
    %27 = arith.mulf %25, %26 : vector<4x256xf32>
    %c0_11 = arith.constant 0 : index
    %c0_12 = arith.constant 0 : index
    %c0_13 = arith.constant 0 : index
    %28 = vector.load %arg6[%c0_11, %c0_12, %c0_13] : memref<1x4x256xf32, #tpu.memory_space<vmem>>, vector<1x4x256xf32>
    %29 = vector.shape_cast %28 : vector<1x4x256xf32> to vector<4x256xf32>
    %30 = arith.addf %27, %29 : vector<4x256xf32>
    %c0_14 = arith.constant 0 : index
    %c0_15 = arith.constant 0 : index
    %c0_16 = arith.constant 0 : index
    %31 = vector.load %arg7[%c0_14, %c0_15, %c0_16] : memref<1x4x256xf32, #tpu.memory_space<vmem>>, vector<1x4x256xf32>
    %32 = vector.shape_cast %31 : vector<1x4x256xf32> to vector<4x256xf32>
    %33 = vector.shape_cast %30 : vector<4x256xf32> to vector<1x4x256xf32>
    tpu.vector_store %arg7[%c0_14, %c0_15, %c0_16], %33 {strides = array<i32>} : memref<1x4x256xf32, #tpu.memory_space<vmem>>, vector<1x4x256xf32>,
    return
  }
  func.func @transform_0(%arg0: i32, %arg1: i32, %arg2: i32) -> (i32, i32, i32) {
    %c0_i32 = arith.constant 0 : i32
    return %arg0, %arg1, %arg2 : i32, i32, i32
  }
  func.func @transform_1(%arg0: i32, %arg1: i32, %arg2: i32) -> (i32, i32) {
    %c0_i32 = arith.constant 0 : i32
    %c0_i32_0 = arith.constant 0 : i32
    return %arg1, %c0_i32 : i32, i32
  }
  func.func @transform_2(%arg0: i32, %arg1: i32, %arg2: i32) -> (i32, i32) {
    %c0_i32 = arith.constant 0 : i32
    %c0_i32_0 = arith.constant 0 : i32
    return %arg1, %c0_i32 : i32, i32
  }
  func.func @transform_3(%arg0: i32, %arg1: i32, %arg2: i32) -> (i32, i32, i32) {
    %c0_i32 = arith.constant 0 : i32
    return %arg0, %arg1, %arg2 : i32, i32, i32
  }
  func.func @transform_4(%arg0: i32, %arg1: i32, %arg2: i32) -> (i32, i32, i32) {
    %c0_i32 = arith.constant 0 : i32
    return %arg0, %arg1, %arg2 : i32, i32, i32
  }
}

</mosaic_0001>

<bundles_post_ra>
// kernel: resblock_forward.4
= control target key start
LH: loop header
LB: loop body
LE: loop exit
PB: predicated region body
PF: predicated region fallthrough
CT: control target
= control target key end

     0   :  { %s554_s12 = smov 0   ;;  %s556_s13 = smov 0   ;;  %s596_s0 = inlined_call_operand.vmem [shape: f32[2,4,256], index: 0, kind: input, shape index: {}]   ;;  %s597_s1 = inlined_call_operand.vmem [shape: f32[4,1], index: 1, kind: input, shape index: {}]   ;;  %s598_s2 = inlined_call_operand.vmem [shape: f32[4,1], index: 2, kind: input, shape index: {}]   ;;  %s599_s3 = inlined_call_operand.vmem [shape: f32[2,4,256], index: 3, kind: output, shape index: {}]  }
   0x1   :  { %s558_s14 = smov 0  }
   0x2 LB: > { %s32_s15 = sadd.s32 1, %s526_s13  ;;  %p468_p0 = scmp.ge.s32.totalorder %s530_s14, 1  ;;  %s530_s14 = sphi %s558_s14, %s13_s14   ;;  %s526_s13 = sphi %s556_s13, %s601_s13   ;;  %s522_s12 = sphi %s554_s12, %s600_s12  }
   0x3   : > { %p34_p1 = scmp.ge.s32.totalorder %s32_s15, 2  ;;  %p191_p2 = scmp.lt.s32.totalorder %s530_s14, 3 }
   0x5   : > { %s603_s15 = smov (%p34_p1, %s32_s15), 0  ;;  %p192_p3 = pnand %p468_p0, %p191_p2 }
   0x6   : > { %v276_v0 = vld [vmem:[%s597_s1] sm:$0xf] (!%p192_p3)  ;;  %v532_v1 = vmov (!%p192_p3), 0   ;;  %p240_p4 = scmp.lt.s32.totalorder (!%p192_p3), %s522_s12, 1  ;;  %v533_v3 = vmov (!%p192_p3), 839922192   ;;  %v284_v5 = vlaneseq (!%p192_p3) }
   0x7   : > { %195 = sbr.rel (%p192_p3) target bundleno = 182 (0xb6), region = 32  ;;  %503 = vset.pattern.permute.xlu0 (!%p192_p3), %v532_v1  ;;  %v290_v2 = vld [vmem:[%s598_s2] sm:$0xf] (!%p192_p3)  ;;  %v282_v4 = vunpack.c.l.s4 (!%p192_p3), %v533_v3 }
   0x8   : > { %279 = vperm.xlu0 (!%p192_p3), %503, %v276_v0   ;;  %v285_v7 = vshrl.u32 (!%p192_p3), %v284_v5, 7 }
   0x9   : > { %v283_v6 = vunpack.c.0.s8 (!%p192_p3), %v282_v4 }
   0xb   : > { %v286_v8 = vsub.s32 (!%p192_p3), %v283_v6, %v285_v7 }
   0xc   : > { %293 = vperm.xlu0 (!%p192_p3), %503, %v290_v2  }
   0xe   : > { %s605_s12 = smov (!%p240_p4, %s522_s12), 1 }
   0xf   : > { %s475_s20 = sshll.u32 %s605_s12, 3 }
  0x10   : > { %s251_s23 = scalar_lea.vmem %s596_s0, %s475_s20  ;;  %s273_s26 = scalar_lea.vmem %s599_s3, %s475_s20 }
  0x11   : > { %v275_v11 = vld [vmem:[%s251_s23] sm:$0xff] }
  0x87   : > { %v280_v9 = vpop.permute.xlu0 %279 }
  0x88   : > { %v287_v10 = vrot.slane %v280_v9, %v286_v8 }
  0x8a   : > { %v289_v13 = vmul.f32 %v287_v10, %v275_v11 }
  0x8b   : > { %v294_v12 = vpop.permute.xlu0 %293 }
  0x8c   : > { %v301_v14 = vrot.slane %v294_v12, %v286_v8 }
  0x8e   : > { %v303_v15 = vadd.f32 %v301_v14, %v289_v13 }
  0x90   : > { %v304_v16 = vand.u32 2147483647, %v303_v15  ;;  %vm309_vm0 = vcmp.ge.f32.partialorder %v303_v15, 0.0 }
  0x92   : > { %v305_v17 = vsub.f32 0.0, %v304_v16 }
  0x94   : > { %v306_v18 = vmul.f32 1.442695, %v305_v17 }
  0x96   : > { %504 = vpow2.f32 %v306_v18 }
  0xa0   : > { %v505_v19 = vpop.eup %504 }
  0xa1   : > { %v308_v20 = vmul.f32 %v505_v19, %v505_v19  ;;  %v310_v21 = vmul.f32 2.0, %v505_v19 }
  0xa3   : > { %v311_v22 = vsel %vm309_vm0, 1.0, %v308_v20  ;;  %v313_v23 = vmul.f32 2.0, %v308_v20 }
  0xa4   : > { %v312_v24 = vadd.f32 %v311_v22, %v310_v21 }
  0xa5   : > { %v314_v25 = vsel %vm309_vm0, %v313_v23, 2.0 }
  0xa6   : > { %v315_v26 = vadd.f32 %v314_v25, %v312_v24  ;;  %v316_v27 = vmul.f32 %v312_v24, %v303_v15 }
  0xa8   : > { %506 = vrcp.f32 %v315_v26 }
  0xb2   : > { %v507_v28 = vpop.eup %506 }
  0xb3   : > { %v318_v29 = vmul.f32 %v507_v28, %v316_v27 }
  0xb5   : > { %319 = vst [vmem:[%s273_s26] sm:$0xff] %v318_v29 }
  0xb6 PF: > { %s13_s14 = sadd.s32 1, %s530_s14   ;;  %s600_s12 = smov %s526_s13 }
  0xb7   : > { %p10_p5 = scmp.ge.s32.totalorder %s13_s14, 4   ;;  %s601_s13 = smov %s603_s15 }
  0xb9   :  { %12 = sbr.rel (!%p10_p5) target bundleno = 2 (0x2), region = 68 }

// kernel: resblock_forward.5
= control target key start
LH: loop header
LB: loop body
LE: loop exit
PB: predicated region body
PF: predicated region fallthrough
CT: control target
= control target key end

     0   :  { %s665_s15 = smov 0   ;;  %s667_s16 = smov 0   ;;  %s712_s0 = inlined_call_operand.vmem [shape: f32[2,4,256], index: 0, kind: input, shape index: {}]   ;;  %s713_s1 = inlined_call_operand.vmem [shape: f32[4,1], index: 1, kind: input, shape index: {}]   ;;  %s714_s2 = inlined_call_operand.vmem [shape: f32[4,1], index: 2, kind: input, shape index: {}]   ;;  %s715_s3 = inlined_call_operand.vmem [shape: f32[2,4,256], index: 3, kind: input, shape index: {}]   ;;  %s716_s4 = inlined_call_operand.vmem [shape: f32[2,4,256], index: 4, kind: output, shape index: {}]  }
   0x1   :  { %s669_s17 = smov 0  }
   0x2 LB: > { %s33_s18 = sadd.s32 1, %s632_s16  ;;  %p571_p0 = scmp.ge.s32.totalorder %s636_s17, 1  ;;  %s636_s17 = sphi %s669_s17, %s14_s17   ;;  %s632_s16 = sphi %s667_s16, %s718_s16   ;;  %s628_s15 = sphi %s665_s15, %s717_s15  }
   0x3   : > { %p35_p1 = scmp.ge.s32.totalorder %s33_s18, 2  ;;  %p239_p2 = scmp.lt.s32.totalorder %s636_s17, 3 }
   0x5   : > { %s720_s18 = smov (%p35_p1, %s33_s18), 0  ;;  %p240_p3 = pnand %p571_p0, %p239_p2 }
   0x6   : > { %v353_v0 = vld [vmem:[%s713_s1] sm:$0xf] (!%p240_p3)  ;;  %v638_v1 = vmov (!%p240_p3), 0   ;;  %p303_p4 = scmp.lt.s32.totalorder (!%p240_p3), %s628_s15, 1  ;;  %v639_v3 = vmov (!%p240_p3), 839922192   ;;  %v361_v5 = vlaneseq (!%p240_p3) }
   0x7   : > { %243 = sbr.rel (%p240_p3) target bundleno = 184 (0xb8), region = 36  ;;  %609 = vset.pattern.permute.xlu0 (!%p240_p3), %v638_v1  ;;  %v367_v2 = vld [vmem:[%s714_s2] sm:$0xf] (!%p240_p3)  ;;  %v359_v4 = vunpack.c.l.s4 (!%p240_p3), %v639_v3 }
   0x8   : > { %356 = vperm.xlu0 (!%p240_p3), %609, %v353_v0   ;;  %v362_v7 = vshrl.u32 (!%p240_p3), %v361_v5, 7 }
   0x9   : > { %v360_v6 = vunpack.c.0.s8 (!%p240_p3), %v359_v4 }
   0xb   : > { %v363_v8 = vsub.s32 (!%p240_p3), %v360_v6, %v362_v7 }
   0xc   : > { %370 = vperm.xlu0 (!%p240_p3), %609, %v367_v2  }
   0xe   : > { %s722_s15 = smov (!%p303_p4, %s628_s15), 1 }
   0xf   : > { %s689_s23 = sshll.u32 %s722_s15, 3 }
  0x10   : > { %s314_s26 = scalar_lea.vmem %s712_s0, %s689_s23  ;;  %s336_s29 = scalar_lea.vmem %s715_s3, %s689_s23 }
  0x11   : > { %v352_v11 = vld [vmem:[%s314_s26] sm:$0xff]  ;;  %s350_s6 = scalar_lea.vmem %s716_s4, %s689_s23 }
  0x12   : > { %v396_v29 = vld [vmem:[%s336_s29] sm:$0xff] }
  0x87   : > { %v357_v9 = vpop.permute.xlu0 %356 }
  0x88   : > { %v364_v10 = vrot.slane %v357_v9, %v363_v8 }
  0x8a   : > { %v366_v13 = vmul.f32 %v364_v10, %v352_v11 }
  0x8b   : > { %v371_v12 = vpop.permute.xlu0 %370 }
  0x8c   : > { %v378_v14 = vrot.slane %v371_v12, %v363_v8 }
  0x8e   : > { %v380_v15 = vadd.f32 %v378_v14, %v366_v13 }
  0x90   : > { %v381_v16 = vand.u32 2147483647, %v380_v15  ;;  %vm386_vm0 = vcmp.ge.f32.partialorder %v380_v15, 0.0 }
  0x92   : > { %v382_v17 = vsub.f32 0.0, %v381_v16 }
  0x94   : > { %v383_v18 = vmul.f32 1.442695, %v382_v17 }
  0x96   : > { %610 = vpow2.f32 %v383_v18 }
  0xa0   : > { %v611_v19 = vpop.eup %610 }
  0xa1   : > { %v385_v20 = vmul.f32 %v611_v19, %v611_v19  ;;  %v387_v21 = vmul.f32 2.0, %v611_v19 }
  0xa3   : > { %v388_v22 = vsel %vm386_vm0, 1.0, %v385_v20  ;;  %v390_v23 = vmul.f32 2.0, %v385_v20 }
  0xa4   : > { %v389_v24 = vadd.f32 %v388_v22, %v387_v21 }
  0xa5   : > { %v391_v25 = vsel %vm386_vm0, %v390_v23, 2.0 }
  0xa6   : > { %v392_v26 = vadd.f32 %v391_v25, %v389_v24  ;;  %v393_v27 = vmul.f32 %v389_v24, %v380_v15 }
  0xa8   : > { %612 = vrcp.f32 %v392_v26 }
  0xb2   : > { %v613_v28 = vpop.eup %612 }
  0xb3   : > { %v395_v30 = vmul.f32 %v613_v28, %v393_v27 }
  0xb5   : > { %v397_v31 = vadd.f32 %v396_v29, %v395_v30 }
  0xb7   : > { %398 = vst [vmem:[%s350_s6] sm:$0xff] %v397_v31 }
  0xb8 PF: > { %s14_s17 = sadd.s32 1, %s636_s17   ;;  %s717_s15 = smov %s632_s16 }
  0xb9   : > { %p11_p5 = scmp.ge.s32.totalorder %s14_s17, 4   ;;  %s718_s16 = smov %s720_s18 }
  0xbb   :  { %13 = sbr.rel (!%p11_p5) target bundleno = 2 (0x2), region = 75 }

</bundles_post_ra>
